<compile_context>
chip_gen: v7x
topology: tpu7x:2x2x1
jax: 0.10.0
libtpu: 0.0.40
codegen_flags: <defaults>
</compile_context>

<pallas_src>
import functools

import numpy as np
import jax
import jax.numpy as jnp
from jax.experimental import pallas as pl
from jax.experimental.pallas import tpu as pltpu


def _round_up(x: int, m: int) -> int:
    return (x + m - 1) // m * m


def _build_pe_table(d_model: int, max_seq_len: int) -> np.ndarray:
    """Sinusoidal table, shape [max_seq_len + 1, d_model]; row 0 is the zero pad row."""
    pos = np.arange(max_seq_len, dtype=np.float64)[:, None]          # [L, 1]
    j = np.arange(d_model, dtype=np.float64)[None, :]                # [1, D]
    angle = pos / np.power(10000.0, 2.0 * np.floor(j / 2.0) / d_model)
    table = np.empty((max_seq_len, d_model), dtype=np.float64)
    table[:, 0::2] = np.sin(angle[:, 0::2])
    table[:, 1::2] = np.cos(angle[:, 1::2])
    full = np.concatenate([np.zeros((1, d_model)), table], axis=0)   # [L+1, D]
    return full.astype(np.float32)


def _pe_kernel(len_ref, pe_ref, out_ref):
    """Masked copy of one (tile_s, d_pad) PE tile for one batch element.

    len_ref : SMEM scalar-prefetch ref, [B] int32 lengths
    pe_ref  : VMEM [tile_s, d_pad]   (PE rows for positions tile_start..)
    out_ref : VMEM [1, tile_s, d_pad]
    """
    s = pl.program_id(0)            # sequence tile (outer)
    b = pl.program_id(1)            # batch element (inner -> input block reuse)
    tile_s = pe_ref.shape[0]
    seq_len = len_ref[b]
    tile_start = s * tile_s

    full_tile = tile_start + tile_s <= seq_len      # every row valid -> plain copy
    empty_tile = tile_start >= seq_len              # every row padding -> zeros

    @pl.when(full_tile)
    def _():
        out_ref[0] = pe_ref[...]

    @pl.when(empty_tile)
    def _():
        out_ref[0] = jnp.zeros(pe_ref.shape, pe_ref.dtype)

    @pl.when(jnp.logical_and(jnp.logical_not(full_tile), jnp.logical_not(empty_tile)))
    def _():
        # Boundary tile only: (tile_s, 1) column iota; compare/select broadcasts
        # along lanes so VALU/vreg cost is ~1/128 of a full 2D iota.
        pos = tile_start + jax.lax.broadcasted_iota(jnp.int32, (tile_s, 1), 0)
        out_ref[0] = jnp.where(pos < seq_len, pe_ref[...], 0.0)


@functools.lru_cache(maxsize=None)
def _make_pe_call(batch: int, padded_len: int, tile_s: int, d_pad: int):
    """Build (and cache per shape bucket) the jitted pallas_call."""
    n_s = padded_len // tile_s
    grid_spec = pltpu.PrefetchScalarGridSpec(
        num_scalar_prefetch=1,
        grid=(n_s, batch),                      # s outer, b inner
        in_specs=[
            # Input block index is independent of the inner batch index -> the
            # slab tile is DMA'd from HBM once per sequence tile and reused.
            pl.BlockSpec((tile_s, d_pad), lambda s, b, lens: (s, 0)),
        ],
        out_specs=pl.BlockSpec((1, tile_s, d_pad), lambda s, b, lens: (b, s, 0)),
    )
    tile_bytes = tile_s * d_pad * 4
    # 1 double-buffered input tile + 1 double-buffered output tile + headroom;
    # capped at 32 MiB so it is safe on v7x's 64 MiB-per-TC VMEM.
    vmem_limit = min(32 << 20, max(16 << 20, 4 * tile_bytes + (2 << 20)))
    call = pl.pallas_call(
        _pe_kernel,
        out_shape=jax.ShapeDtypeStruct((batch, padded_len, d_pad), jnp.float32),
        grid_spec=grid_spec,
        compiler_params=pltpu.CompilerParams(
            # s: megacore-parallel (v7x); b: inner serial axis -> keeps the
            # constant-input-block DMA reuse on each core.
            dimension_semantics=("parallel", "arbitrary"),
            vmem_limit_bytes=vmem_limit,
        ),
    )
    return jax.jit(call)


class PositionalEncodingPallas:
    """Pallas TPU equivalent of the PyTorch PositionalEncoding module."""

    def __init__(self, d_model: int, max_seq_len: int, *,
                 tile_s_max: int = 1024, vmem_budget_bytes: int = 24 << 20):
        self.d_model = d_model
        self.max_seq_len = max_seq_len
        table = _build_pe_table(d_model, max_seq_len)        # [L+1, D], row 0 = pad
        self.pe_table = jnp.asarray(table)                   # exact module weights

        # Lane-dense layout: pad feature dim to a multiple of 128 so every
        # output store in the kernel is an unmasked, full-lane vst.
        self.d_pad = _round_up(d_model, 128)

        # Largest sequence tile (multiple of 8) whose 4 pipeline buffers fit
        # the VMEM budget; capped at tile_s_max.  With d_pad=128 a 1024-row
        # tile is a 512 KiB block, big enough to amortise per-step overhead.
        rows_cap = max(8, (vmem_budget_bytes // (16 * self.d_pad)) // 8 * 8)
        self.tile_s_cap = min(tile_s_max, rows_cap)

        # Pre-padded PE slab (positions 1..max_seq_len; zero rows/cols beyond),
        # built once so forward() only slices it (no per-call pad/scatter).
        # Length covers the worst-case bucketed padded_len (<= base + 8*n_s).
        base_max = _round_up(max(max_seq_len, 8), 8)
        slab_len = base_max + 8 * pl.cdiv(base_max, self.tile_s_cap)
        self.slab_len = slab_len
        slab = np.zeros((slab_len, self.d_pad), np.float32)
        slab[:max_seq_len, :d_model] = table[1:]
        self.slab = jnp.asarray(slab)
        self._slab_by_len = {}                                # cached device slices

    def _bucket(self, max_len: int):
        """Tile-multiple padded length that overshoots max_len by at most ~8 rows/tile."""
        base = _round_up(max(max_len, 8), 8)
        if base <= self.tile_s_cap:
            return base, base
        n_s = pl.cdiv(base, self.tile_s_cap)
        tile_s = _round_up(pl.cdiv(base, n_s), 8)
        return n_s * tile_s, tile_s

    def __call__(self, input_len, max_len=None):
        lengths = jnp.asarray(input_len).reshape(-1).astype(jnp.int32)   # [B]
        batch = int(lengths.shape[0])
        if max_len is None:
            # The *output shape* is data-dependent in the PyTorch module, so one
            # host sync is unavoidable here.  Callers inside jit should pass a
            # static `max_len` bound (>= true max(input_len)) to skip it.
            max_len = int(jax.device_get(jnp.max(lengths)))
        max_len = int(max_len)
        if max_len > self.max_seq_len:
            raise ValueError("max(input_len) exceeds max_seq_len")
        # TODO(synk): if a caller passes max_len < true max(input_len), extra rows
        # are silently dropped (PyTorch always derives max_len from the data).

        padded_len, tile_s = self._bucket(max_len)
        slab = self._slab_by_len.get(padded_len)
        if slab is None:
            slab = self.slab[:padded_len]                     # one-time slice per bucket
            self._slab_by_len[padded_len] = slab
        call = _make_pe_call(batch, padded_len, tile_s, self.d_pad)
        out = call(lengths, slab)                             # [B, padded_len, d_pad]
        # Strip bucketing padding only when it is not an identity slice: the
        # kernel output is single-pass, and an extra full-array slice copy
        # would double HBM traffic for nothing.
        if max_len == padded_len and self.d_model == self.d_pad:
            return out
        return out[:, :max_len, :self.d_model]


def _reference_forward(pe_table_np: np.ndarray, input_len_np: np.ndarray) -> np.ndarray:
    """Pure-numpy reference mirroring the PyTorch forward."""
    lengths = np.asarray(input_len_np).reshape(-1).astype(np.int64)
    max_len = int(lengths.max())
    idx = np.zeros((lengths.shape[0], max_len), dtype=np.int64)
    for b, L in enumerate(lengths):
        idx[b, :L] = np.arange(1, L + 1)
    return np.asarray(pe_table_np)[idx]


if __name__ == "__main__":
    # --- small test (module-scale shapes) ---
    d_model, max_seq_len, batch = 32, 10, 4
    pe = PositionalEncodingPallas(d_model, max_seq_len)
    key = jax.random.PRNGKey(0)
    input_len = jax.random.randint(
        key, shape=(batch, 1), minval=1, maxval=max_seq_len + 1, dtype=jnp.int32
    )
    out = jax.block_until_ready(pe(input_len))
    ref = _reference_forward(np.asarray(pe.pe_table), np.asarray(input_len))
    np.testing.assert_allclose(np.asarray(out), ref, rtol=1e-6, atol=1e-6)

    # --- second test exercising the multi-tile grid (full / partial / empty tiles)
    #     and the input-block reuse across the inner batch axis ---
    d_model2, max_seq_len2 = 256, 800
    pe2 = PositionalEncodingPallas(d_model2, max_seq_len2, tile_s_max=256)
    input_len2 = jnp.array([[700], [300]], dtype=jnp.int32)
    out2 = jax.block_until_ready(pe2(input_len2))
    ref2 = _reference_forward(np.asarray(pe2.pe_table), np.asarray(input_len2))
    np.testing.assert_allclose(np.asarray(out2), ref2, rtol=1e-6, atol=1e-6)

    print("KERNEL_OK")
</pallas_src>

<mosaic_0001>
module attributes {stable_mosaic.version = 11 : i64} {
  func.func @_pe_kernel(%arg0: i32, %arg1: i32, %arg2: memref<4xi32, #tpu.memory_space<smem>>, %arg3: memref<16x128xf32, #tpu.memory_space<vmem>>, %arg4: memref<1x16x128xf32, #tpu.memory_space<vmem>>) attributes {dimension_semantics = [#tpu.dimension_semantics<parallel>, #tpu.dimension_semantics<arbitrary>], iteration_bounds = array<i64: 1, 4>, scalar_prefetch = 1 : i64, scratch_operands = 0 : i64, tpu.core_type = #tpu.core_type<tc>, window_params = [{transform_indices = @transform_0, window_bounds = array<i64: 16, 128>}, {transform_indices = @transform_1, window_bounds = array<i64: 1, 16, 128>}]} {
    %0 = arith.index_cast %arg1 : i32 to index
    %1 = memref.load %arg2[%0] : memref<4xi32, #tpu.memory_space<smem>>
    %c16_i32 = arith.constant 16 : i32
    %2 = arith.muli %arg0, %c16_i32 : i32
    %c16_i32_0 = arith.constant 16 : i32
    %3 = arith.addi %2, %c16_i32_0 : i32
    %4 = arith.cmpi sle, %3, %1 : i32
    %5 = arith.cmpi sge, %2, %1 : i32
    %6 = arith.extui %4 : i1 to i32
    %c0_i32 = arith.constant 0 : i32
    %7 = arith.cmpi ne, %6, %c0_i32 : i32
    scf.if %7 {
      %c0 = arith.constant 0 : index
      %c0_4 = arith.constant 0 : index
      %15 = vector.load %arg3[%c0, %c0_4] : memref<16x128xf32, #tpu.memory_space<vmem>>, vector<16x128xf32>
      %c0_5 = arith.constant 0 : index
      %c0_6 = arith.constant 0 : index
      %c0_7 = arith.constant 0 : index
      %16 = vector.load %arg4[%c0_5, %c0_6, %c0_7] : memref<1x16x128xf32, #tpu.memory_space<vmem>>, vector<1x16x128xf32>
      %17 = vector.shape_cast %16 : vector<1x16x128xf32> to vector<16x128xf32>
      %18 = vector.shape_cast %15 : vector<16x128xf32> to vector<1x16x128xf32>
      tpu.vector_store %arg4[%c0_5, %c0_6, %c0_7], %18 {strides = array<i32>} : memref<1x16x128xf32, #tpu.memory_space<vmem>>, vector<1x16x128xf32>,
    } else {
    }
    %8 = arith.extui %5 : i1 to i32
    %c0_i32_1 = arith.constant 0 : i32
    %9 = arith.cmpi ne, %8, %c0_i32_1 : i32
    scf.if %9 {
      %cst = arith.constant 0.000000e+00 : f32
      %15 = vector.broadcast %cst : f32 to vector<16x128xf32>
      %c0 = arith.constant 0 : index
      %c0_4 = arith.constant 0 : index
      %c0_5 = arith.constant 0 : index
      %16 = vector.load %arg4[%c0, %c0_4, %c0_5] : memref<1x16x128xf32, #tpu.memory_space<vmem>>, vector<1x16x128xf32>
      %17 = vector.shape_cast %16 : vector<1x16x128xf32> to vector<16x128xf32>
      %18 = vector.shape_cast %15 : vector<16x128xf32> to vector<1x16x128xf32>
      tpu.vector_store %arg4[%c0, %c0_4, %c0_5], %18 {strides = array<i32>} : memref<1x16x128xf32, #tpu.memory_space<vmem>>, vector<1x16x128xf32>,
    } else {
    }
    %true = arith.constant true
    %10 = arith.xori %4, %true : i1
    %true_2 = arith.constant true
    %11 = arith.xori %5, %true_2 : i1
    %12 = arith.andi %10, %11 : i1
    %13 = arith.extui %12 : i1 to i32
    %c0_i32_3 = arith.constant 0 : i32
    %14 = arith.cmpi ne, %13, %c0_i32_3 : i32
    scf.if %14 {
      %15 = tpu.iota {dimensions = array<i32: 0>} : vector<16x1xi32>
      %16 = vector.broadcast %2 : i32 to vector<16x1xi32>
      %17 = arith.addi %16, %15 : vector<16x1xi32>
      %18 = vector.broadcast %1 : i32 to vector<16x1xi32>
      %19 = arith.cmpi slt, %17, %18 : vector<16x1xi32>
      %c0 = arith.constant 0 : index
      %c0_4 = arith.constant 0 : index
      %20 = vector.load %arg3[%c0, %c0_4] : memref<16x128xf32, #tpu.memory_space<vmem>>, vector<16x128xf32>
      %cst = arith.constant 0.000000e+00 : f32
      %21 = vector.shape_cast %19 : vector<16x1xi1> to vector<16x1xi1>
      %22 = vector.broadcast %21 : vector<16x1xi1> to vector<16x128xi1>
      %23 = vector.broadcast %cst : f32 to vector<16x128xf32>
      %24 = arith.select %22, %20, %23 : vector<16x128xi1>, vector<16x128xf32>
      %c0_5 = arith.constant 0 : index
      %c0_6 = arith.constant 0 : index
      %c0_7 = arith.constant 0 : index
      %25 = vector.load %arg4[%c0_5, %c0_6, %c0_7] : memref<1x16x128xf32, #tpu.memory_space<vmem>>, vector<1x16x128xf32>
      %26 = vector.shape_cast %25 : vector<1x16x128xf32> to vector<16x128xf32>
      %27 = vector.shape_cast %24 : vector<16x128xf32> to vector<1x16x128xf32>
      tpu.vector_store %arg4[%c0_5, %c0_6, %c0_7], %27 {strides = array<i32>} : memref<1x16x128xf32, #tpu.memory_space<vmem>>, vector<1x16x128xf32>,
    } else {
    }
    return
  }
  func.func @transform_0(%arg0: i32, %arg1: i32, %arg2: memref<4xi32, #tpu.memory_space<smem>>) -> (i32, i32) {
    %c0_i32 = arith.constant 0 : i32
    %c0_i32_0 = arith.constant 0 : i32
    return %arg0, %c0_i32 : i32, i32
  }
  func.func @transform_1(%arg0: i32, %arg1: i32, %arg2: memref<4xi32, #tpu.memory_space<smem>>) -> (i32, i32, i32) {
    %c0_i32 = arith.constant 0 : i32
    %c0_i32_0 = arith.constant 0 : i32
    return %arg1, %arg0, %c0_i32 : i32, i32, i32
  }
}

</mosaic_0001>

<bundles_post_ra>
// kernel: tpu_custom_call.1
= control target key start
LH: loop header
LB: loop body
LE: loop exit
PB: predicated region body
PF: predicated region fallthrough
CT: control target
= control target key end

     0   :  { %s686_s0 = inlined_call_operand.hbm [shape: s32[4], index: 0, kind: input, shape index: {}]   ;;  %s687_s1 = inlined_call_operand.hbm [shape: f32[16,128], index: 1, kind: input, shape index: {}]   ;;  %s688_s2 = inlined_call_operand.hbm [shape: f32[4,16,128], index: 2, kind: output, shape index: {}]  }
   0x1   :  { %s363_s11 = scalar_lea.hbm %s686_s0, 16 }
   0x2   :  { %p364_p0 = scmp.ne.s32.totalorder %s686_s0, %s363_s11  ;;  %p367_p1 = scmp.lt.u32.totalorder %s363_s11, %s686_s0 }
   0x4   :  { %p369_p2 = pnand %p367_p1, %p364_p0 }
   0x6   :  { %372 = shalt.err (!%p369_p2)  }
   0x7   :  { %s487_s16 = smov [#allocation3]  }
   0x8   :  { %8 = dma.hbm_to_smem %s686_s0, 16, %s487_s16, [#allocation2] }
   0x9   :  { %453 = dma.done.wait [#allocation2], 16 }
   0xa   :  { %454 = vsyncadd [#allocation2], 4294967280 }
   0xb   :  { %10 = sfence }
   0xc   :  { %11 = vsyncpa [#allocation5], 0 }
   0xd   :  { %12 = vsyncpa [#allocation6], 0 }
   0xe   :  { %14 = vsyncpa [#allocation6 + $0x1], 0  ;;  %s522_s19 = smov 0   ;;  %s524_s20 = smov 0  }
   0xf   :  { %s526_s21 = smov 0   ;;  %s528_s22 = smov 0  }
  0x10   :  { %s530_s23 = smov 0   ;;  %s532_s24 = smov 0  }
  0x11 LB: > { %s272_s0 = sadd.s32 4294967295, %s485_s24   ;;  %s273_s25 = sadd.s32 4294967294, %s485_s24   ;;  %s485_s24 = sphi %s532_s24, %s20_s24   ;;  %s481_s23 = sphi %s530_s23, %s706_s23   ;;  %s477_s22 = sphi %s528_s22, %s705_s22   ;;  %s473_s21 = sphi %s526_s21, %s704_s21   ;;  %s469_s20 = sphi %s524_s20, %s703_s20   ;;  %s465_s19 = sphi %s522_s19, %s702_s19  }
  0x12   : > { %s29_s26 = sadd.s32 1, %s481_s23  ;;  %s67_s27 = sadd.s32 1, %s473_s21 }
  0x13   : > { %p30_p3 = scmp.ge.s32.totalorder %s29_s26, 4  ;;  %p77_p4 = scmp.ne.s32.totalorder %s473_s21, %s469_s20 }
  0x14   : > { %p78_p5 = scmp.eq.s32.totalorder %s272_s0, 3  ;;  %p83_p6 = scmp.ne.s32.totalorder %s469_s20, %s465_s19 }
  0x15   : > { %s708_s26 = smov (%p30_p3, %s29_s26), 0  ;;  %p84_p8 = scmp.eq.s32.totalorder %s273_s25, 3 }
  0x16   : > { %p562_p7 = por %p78_p5, %p77_p4  ;;  %s62_s29 = ssub.s32 %s481_s23, %s708_s26 }
  0x17   : > { %p274_p9 = scmp.ge.s32.totalorder %s485_s24, 1  ;;  %p65_p10 = scmp.eq.s32.totalorder %s62_s29, 0 }
  0x18   : > { %s693_s28 = scalar_select %p562_p7, 1, 0 }
  0x19   : > { %p569_p11 = por %p84_p8, %p83_p6  ;;  %p91_p12 = scmp.lt.s32.totalorder %s485_s24, 5 }
  0x1a   : > { %s575_s3 = scalar_select %p65_p10, %s473_s21, %s67_s27  }
  0x1b   : > { %s694_s30 = scalar_select %p569_p11, 1, 0 }
  0x1c   : > { %p577_p13 = pnand %p274_p9, %p91_p12  ;;  %p581_p0 = scmp.eq.s32.totalorder %s272_s0, 0 }
  0x1d   : > { %s488_s6 = smov [#allocation4]   ;;  %s373_s11 = scalar_lea.hbm %s687_s1, 256 }
  0x1e   : > { %s695_s4 = scalar_select %p577_p13, 1, 0 }
  0x1f   : > { %s696_s5 = scalar_select %p581_p0, 1, 0 }
  0x20   : > { %p297_p1 = pneg %p577_p13  ;;  %s106_s7 = sshll.u32 %s488_s6, 4  ;;  %s107_s7 = int_to_ptr.vmem [resolvable:$true] %s106_s7 }
  0x21   : > { %p374_p3 = scmp.ne.s32.totalorder %s687_s1, %s373_s11  ;;  %p380_p8 = scmp.lt.u32.totalorder %s373_s11, %s687_s1 }
  0x22   : > { %p589_p2 = pnand %p581_p0, %p297_p1 }
  0x24   : > { %p375_p4 = pneg %p589_p2 }
  0x26   : > { %p376_p5 = pnand %p375_p4, %p374_p3 }
  0x28   : > { %p377_p6 = pneg %p376_p5 }
  0x2a   : > { %p382_p9 = pnand %p380_p8, %p377_p6 }
  0x2c   : > { %385 = shalt.err (!%p382_p9)
}
  0x2d   : > { %s386_s16 = scalar_lea.vmem %s107_s7, 256  ;;  %p394_p11 = scmp.lt.s32.totalorder %s107_s7, %s107_s7 }
  0x2e   : > { %p387_p10 = scmp.ne.s32.totalorder %s107_s7, %s386_s16  ;;  %p395_p7 = scmp.lt.s32.totalorder %s386_s16, %s386_s16 }
  0x30   : > { %p389_p12 = pnand %p387_p10, %p375_p4  ;;  %p396_p0 = por %p395_p7, %p394_p11 }
  0x32   : > { %p390_p1 = pneg %p389_p12 }
  0x34   : > { %p397_p13 = pnand %p396_p0, %p390_p1 }
  0x36   : > { %400 = shalt.err (!%p397_p13)
}
  0x37   : > { %s489_s17 = smov 128   ;;  %s490_s18 = smov 8  }
  0x38   : > { %300 = dma.hbm_to_vmem [thread:$0]  (!%p589_p2), %s687_s1, 256, %s107_s7, [#allocation5], %s489_s17, %s489_s17, %s490_s18  }
  0x39   : > { %p698_p3 = scmp.ne.s32.totalorder %s695_s4, 0 }
  0x3a   : > { %p699_p5 = scmp.ne.s32.totalorder (!%p698_p3), %s696_s5, 0 }
  0x3b   : > { %122 = sbr.rel (%p698_p3) target bundleno = 127 (0x7f), region = 24 }
  0x42   : > { %456 = dma.done.wait (%p699_p5), [#allocation5], 256  }
  0x43   : > { %458 = vsyncadd (%p699_p5), [#allocation5], 4294967040  ;;  %s134_s27 = sand.u32 1, %s469_s20   ;;  %s139_s29 = sld [smem:[#allocation3 + %s477_s22]] }
  0x44   : > { %s278_s6 = sshll.u32 %s134_s27, 4 }
  0x45   : > { %s619_s8 = scalar_lea.vmem [#allocation7], %s278_s6 }
  0x49   : > { %p281_p7 = scmp.lt.s32.totalorder %s139_s29, 16 }
  0x4a   : > { %v147_v0 = vld [vmem:[#allocation4] sm:$0xff] (!%p281_p7)  ;;  %v148_v1 = vld [vmem:[#allocation4 + $0x8] sm:$0xff] (!%p281_p7) }
  0x4b   : > { %146 = sbr.rel (%p281_p7) target bundleno = 82 (0x52), region = 32  ;;  %149 = vst [vmem:[%s619_s8] sm:$0xff] (!%p281_p7), %v147_v0  ;;  %150 = vst [vmem:[%s619_s8 + $0x8] sm:$0xff] (!%p281_p7), %v148_v1 }
  0x52 PF: > { %p282_p11 = scmp.gt.s32.totalorder %s139_s29, 0 }
  0x53   : > { %v491_v2 = vmov (!%p282_p11), 0.0  }
  0x54   : > { %153 = sbr.rel (%p282_p11) target bundleno = 91 (0x5b), region = 36  ;;  %154 = vst [vmem:[%s619_s8] sm:$0xff] (!%p282_p11), %v491_v2  ;;  %155 = vst [vmem:[%s619_s8 + $0x8] sm:$0xff] (!%p282_p11), %v491_v2 }
  0x5b PF: > { %p158_p13 = pnand %p282_p11, %p281_p7 }
  0x5c   : > { %v162_v3 = vlaneseq (!%p158_p13)  ;;  %v168_v4 = vstv (!%p158_p13), %s139_s29  ;;  %v171_v6 = vld [vmem:[#allocation4] sm:$0xff] (!%p158_p13)  ;;  %v172_v8 = vld [vmem:[#allocation4 + $0x8] sm:$0xff] (!%p158_p13) }
  0x5d   : > { %161 = sbr.rel (%p158_p13) target bundleno = 101 (0x65), region = 40 }
  0x5e   : > { %v163_v5 = vshrl.u32 (!%p158_p13), %v162_v3, 7 }
  0x60   : > { %vm169_vm0 = vcmp.lt.s32.totalorder (!%p158_p13), %v163_v5, %v168_v4  ;;  %v164_v7 = vadd.s32 (!%p158_p13), 8, %v163_v5 }
  0x61   : > { %v177_v9 = vsel (!%p158_p13), %vm169_vm0, %v171_v6, 0.0 }
  0x62   : > { %179 = vst [vmem:[%s619_s8] sm:$0xff] (!%p158_p13), %v177_v9  ;;  %vm170_vm1 = vcmp.lt.s32.totalorder (!%p158_p13), %v164_v7, %v168_v4 }
  0x63   : > { %v178_v10 = vsel (!%p158_p13), %vm170_vm1, %v172_v8, 0.0 }
  0x64   : > { %180 = vst [vmem:[%s619_s8 + $0x8] sm:$0xff] %v178_v10 }
  0x65 PF: > { %s290_s4 = sshll.u32 %s477_s22, 8  ;;  %s197_s10 = sshll.u32 %s619_s8, 4  ;;  %s636_s10 = int_to_ptr.vmem [resolvable:$true] %s197_s10 }
  0x66   : > { %s633_s9 = scalar_lea.hbm %s688_s2, %s290_s4  ;;  %s640_s11 = scalar_lea.sflag [#allocation6], %s134_s27 }
  0x67   : > { %s401_s12 = scalar_lea.vmem %s636_s10, 256  ;;  %p700_p2 = scmp.ne.s32.totalorder %s693_s28, 0 }
  0x68   : > { %p402_p0 = scmp.ne.s32.totalorder %s636_s10, %s401_s12  ;;  %s492_s22 = smov [#allocation7]  }
  0x69   : > { %s405_s13 = sshll.u32 %s492_s22, 4  ;;  %s406_s13 = int_to_ptr.vmem [resolvable:$false] %s405_s13 }
  0x6a   : > { %p403_p4 = pnand %p402_p0, %p700_p2  ;;  %s407_s14 = scalar_lea.vmem %s406_s13, 512 }
  0x6b   : > { %p408_p8 = scmp.lt.s32.totalorder %s636_s10, %s406_s13  ;;  %p409_p9 = scmp.lt.s32.totalorder %s407_s14, %s401_s12 }
  0x6c   : > { %p404_p6 = pneg %p403_p4 }
  0x6d   : > { %p410_p10 = por %p409_p9, %p408_p8 }
  0x6f   : > { %p411_p12 = pnand %p410_p10, %p404_p6 }
  0x71   : > { %414 = shalt.err (!%p411_p12)
}
  0x72   : > { %s415_s15 = scalar_lea.hbm %s633_s9, 256  ;;  %s419_s18 = scalar_lea.hbm %s688_s2, 1024 }
  0x73   : > { %p416_p1 = scmp.ne.s32.totalorder %s633_s9, %s415_s15  ;;  %p420_p7 = scmp.lt.u32.totalorder %s633_s9, %s688_s2 }
  0x74   : > { %p421_p11 = scmp.lt.u32.totalorder %s419_s18, %s415_s15  ;;  %p423_p0 = scmp.lt.u32.totalorder %s415_s15, %s633_s9 }
  0x75   : > { %p417_p3 = pnand %p416_p1, %p700_p2 }
  0x76   : > { %p422_p13 = por %p421_p11, %p420_p7 }
  0x77   : > { %p418_p5 = pneg %p417_p3 }
  0x78   : > { %p424_p4 = por %p423_p0, %p422_p13 }
  0x7a   : > { %p425_p6 = pnand %p424_p4, %p418_p5 }
  0x7c   : > { %428 = shalt.err (!%p425_p6)
}
  0x7d   : > { %s493_s27 = smov 128   ;;  %s494_s29 = smov 8  }
  0x7e   : > { %295 = dma.vmem_to_hbm [thread:$0]  (%p700_p2), %s636_s10, 256, %s633_s9, %s640_s11, %s493_s27, %s493_s27, %s494_s29  }
  0x7f PF: > { %p307_p8 = scmp.ge.s32.totalorder %s485_s24, 2  ;;  %s212_s6 = sand.u32 1, %s465_s19  }
  0x80   : > { %p701_p9 = scmp.ne.s32.totalorder %s694_s30, 0  ;;  %s213_s8 = scalar_lea.sflag [#allocation6], %s212_s6 }
  0x82   : > { %p302_p10 = pnand %p307_p8, %p701_p9 }
  0x84   : > { %460 = dma.done.wait (!%p302_p10), %s213_s8, 256  }
  0x85   : > { %462 = vsyncadd (!%p302_p10), %s213_s8, 4294967040  ;;  %s20_s24 = sadd.s32 1, %s485_s24   ;;  %s702_s19 = smov %s469_s20 }
  0x86   : > { %p17_p12 = scmp.ge.s32.totalorder %s20_s24, 6   ;;  %s703_s20 = smov %s473_s21 }
  0x87   : > { %s704_s21 = smov %s575_s3  ;;  %s705_s22 = smov %s481_s23 }
  0x88   : > { %s706_s23 = smov %s708_s26  ;;  %19 = sbr.rel (!%p17_p12) target bundleno = 17 (0x11), region = 74 }
  0x8f   :  { %218 = vsyncpa [#allocation5], 1 }
  0x90   :  { %220 = vsyncpa [#allocation5 + $0x1], 1 }
  0x91   :  { %221 = vsyncpa [#allocation6], 1 }
  0x92   :  { %223 = vsyncpa [#allocation6 + $0x1], 1 }

</bundles_post_ra>
